<compile_context>
chip_gen: v5e
topology: v5e:2x2
jax: 0.10.0
libtpu: 0.0.40
codegen_flags: <defaults>
</compile_context>

<pallas_src>
import functools

import jax
import jax.numpy as jnp
from jax.experimental import pallas as pl
from jax.experimental.pallas import tpu as pltpu

_LANES = 128


def _round_up(a, b):
    return -(-a // b) * b


def _piecewise_lin_kernel(csum_ref, wsh_ref, x_ref, o_ref, *, n):
    # x block: (tm, 128) in the caller's dtype.  Compute in f32 in-kernel.
    x = x_ref[...].astype(jnp.float32)
    y = jnp.float32(n) * x
    # f32 -> s32 convert truncates toward zero (matches torch .long()); the
    # fractional part is recovered without a separate trunc op.
    idx = y.astype(jnp.int32)
    f = y - idx.astype(jnp.float32)

    # Select-overwrite gather of both tables with one compare per entry.
    # Entry 0 is the init value (also covers idx <= 0, i.e. the lower clamp);
    # the final compare (idx >= n) absorbs the upper clamp.  Table entries are
    # SMEM scalar reads + splat, so the loop is pure VALU (cmp + 2 selects).
    csum_g = jnp.full_like(y, csum_ref[0])
    w_g = jnp.full_like(y, wsh_ref[0])
    for k in range(1, n + 1):
        m = (idx >= n) if k == n else (idx == k)
        csum_g = jnp.where(m, csum_ref[k], csum_g)
        w_g = jnp.where(m, wsh_ref[k], w_g)

    o_ref[...] = (csum_g + f * w_g).astype(o_ref.dtype)


def _choose_row_tile(rows, sublane, itemsize):
    """Row-tile height for (rows, 128) blocks with a cdiv grid.

    Fixed large tiles (~2 MiB) regardless of divisibility; Pallas masks the
    ragged final block.  Tiles >= 512 rows measure >= 85% of HBM roofline, so
    there is no need to chase exact divisors (which previously collapsed to
    sublane-sized tiles for awkward row counts).
    """
    if rows <= sublane:
        return rows  # one full-array block (block == array dims is always legal)
    target_bytes = 2 << 20                      # per-block; ~8 MiB live when double-buffered in+out
    max_tm = max(sublane, (target_bytes // (_LANES * itemsize)) // sublane * sublane)
    tm = min(max_tm, (rows // sublane) * sublane)
    # If one step would cover everything but there is enough data that a half
    # tile is still large, split in two so v7x's second TensorCore gets work
    # ("parallel" grid axis).  Costs one extra ~0.35 us step on 1-TC v5e/v6e.
    if rows >= 1024 and pl.cdiv(rows, tm) < 2:
        tm = _round_up(pl.cdiv(rows, 2), sublane)
    return tm


def piecewise_lin(x, weight):
    """Pallas implementation of PiecewiseLin.forward.

    x:      array of arbitrary shape (values expected in [0, 1]).
    weight: float array of shape (n+1,).

    Output dtype matches x for floating inputs; integer inputs (outside the
    module's real domain) return float32.
    """
    n = int(weight.shape[0]) - 1

    # Tiny (n+1)-element parameter glue stays in plain JAX.
    w = jnp.abs(weight.astype(jnp.float32))
    w = w / jnp.sum(w)
    csum = jnp.cumsum(w)
    # Pre-shifted weight table: w_shift[k] == w[min(k + 1, n)], so one clamped
    # index (and one mask per entry) serves both gathers.
    w_shift = jnp.concatenate([w[1:], w[n:n + 1]])

    orig_shape = x.shape
    orig_dtype = x.dtype

    # No wrapper-side casts for supported dtypes: declare pallas I/O in the
    # input dtype and upcast in-kernel.  Only 8-byte / bool inputs (not native
    # TPU VMEM tile dtypes, and outside the module's domain) fall back to f32.
    d = jnp.dtype(orig_dtype)
    if d.itemsize > 4 or d == jnp.dtype(bool):
        x = x.astype(jnp.float32)
        d = jnp.dtype(jnp.float32)
    in_dtype = d
    out_dtype = d if jnp.issubdtype(d, jnp.floating) else jnp.dtype(jnp.float32)
    sublane = 8 * (4 // d.itemsize)

    flat = x.reshape(-1)
    total = flat.shape[0]
    pad = (-total) % _LANES
    if pad:
        # Rare ragged-total path: <=127-element pad so the slab is lane-dense.
        # (Still one extra XLA pad + slice pass; common NCHW sizes skip this.)
        flat = jnp.pad(flat, (0, pad))
    rows = flat.shape[0] // _LANES
    x2 = flat.reshape(rows, _LANES)

    tm = _choose_row_tile(rows, sublane, d.itemsize)
    grid = (pl.cdiv(rows, tm),)

    out2 = pl.pallas_call(
        functools.partial(_piecewise_lin_kernel, n=n),
        out_shape=jax.ShapeDtypeStruct((rows, _LANES), out_dtype),
        grid_spec=pltpu.PrefetchScalarGridSpec(
            num_scalar_prefetch=0,
            grid=grid,
            in_specs=[
                pl.BlockSpec(memory_space=pltpu.MemorySpace.SMEM),  # csum   (n+1,)
                pl.BlockSpec(memory_space=pltpu.MemorySpace.SMEM),  # w_shift(n+1,)
                pl.BlockSpec((tm, _LANES), lambda i: (i, 0)),
            ],
            out_specs=pl.BlockSpec((tm, _LANES), lambda i: (i, 0)),
        ),
        compiler_params=pltpu.CompilerParams(
            dimension_semantics=("parallel",),
        ),
    )(csum, w_shift, x2)

    out_flat = out2.reshape(-1)
    if pad:
        out_flat = out_flat[:total]
    out = out_flat.reshape(orig_shape)
    # Only the rare f64-input fallback needs a cast back; float32/bf16/f16 I/O
    # already matches the input dtype.
    if jnp.issubdtype(jnp.dtype(orig_dtype), jnp.floating) and out.dtype != orig_dtype:
        out = out.astype(orig_dtype)
    return out


def _reference(x, weight):
    """Pure-JAX reference matching the PyTorch module (x in [0, 1])."""
    n = int(weight.shape[0]) - 1
    w = jnp.abs(weight.astype(jnp.float32))
    w = w / jnp.sum(w)
    csum = jnp.cumsum(w)
    y = n * x.astype(jnp.float32)
    t = jnp.trunc(y)
    f = y - t
    idx = t.astype(jnp.int32)
    out = jnp.take(csum, jnp.clip(idx, 0, n)) + f * jnp.take(
        w, jnp.clip(idx + 1, 0, n))
    return out.astype(x.dtype)


if __name__ == "__main__":
    n = 16
    key = jax.random.PRNGKey(0)
    k_x, k_w = jax.random.split(key)

    # NCHW-style input with values in [0, 1), as the module expects.
    x = jax.random.uniform(k_x, (2, 4, 16, 16), dtype=jnp.float32)

    # (a) Module-default parameters: weight = ones(n+1); weight[0] = 0.
    weight0 = jnp.ones((n + 1,), jnp.float32).at[0].set(0.0)
    # (b) A random "trained" weight to exercise a non-trivial table.
    weight1 = jax.random.uniform(k_w, (n + 1,), jnp.float32, 0.1, 1.0)

    ok = True
    for weight in (weight0, weight1):
        out = jax.block_until_ready(piecewise_lin(x, weight))
        ref = _reference(x, weight)
        ok &= bool(out.shape == x.shape and out.dtype == x.dtype)
        ok &= bool(jnp.allclose(out, ref, atol=1e-6, rtol=1e-6))

    # Ragged flattened size (exercises the cdiv grid / pad-only-when-needed path).
    x_rag = jax.random.uniform(jax.random.PRNGKey(1), (3, 7, 11), dtype=jnp.float32)
    out_rag = jax.block_until_ready(piecewise_lin(x_rag, weight1))
    ok &= bool(out_rag.shape == x_rag.shape)
    ok &= bool(jnp.allclose(out_rag, _reference(x_rag, weight1), atol=1e-6, rtol=1e-6))

    if ok:
        print("KERNEL_OK")
</pallas_src>

<mosaic_0001>
module attributes {stable_mosaic.version = 11 : i64} {
  func.func @_piecewise_lin_kernel(%arg0: i32, %arg1: memref<17xf32, #tpu.memory_space<smem>>, %arg2: memref<17xf32, #tpu.memory_space<smem>>, %arg3: memref<16x128xf32, #tpu.memory_space<vmem>>, %arg4: memref<16x128xf32, #tpu.memory_space<vmem>>) attributes {dimension_semantics = [#tpu.dimension_semantics<parallel>], iteration_bounds = array<i64: 1>, scalar_prefetch = 0 : i64, scratch_operands = 0 : i64, tpu.core_type = #tpu.core_type<tc>, window_params = [{transform_indices = @transform_0, window_bounds = array<i64: 17>}, {transform_indices = @transform_1, window_bounds = array<i64: 17>}, {transform_indices = @transform_2, window_bounds = array<i64: 16, 128>}, {transform_indices = @transform_3, window_bounds = array<i64: 16, 128>}]} {
    %c0 = arith.constant 0 : index
    %c0_0 = arith.constant 0 : index
    %0 = vector.load %arg3[%c0, %c0_0] : memref<16x128xf32, #tpu.memory_space<vmem>>, vector<16x128xf32>
    %cst = arith.constant 1.600000e+01 : f32
    %1 = vector.broadcast %cst : f32 to vector<16x128xf32>
    %2 = arith.mulf %1, %0 : vector<16x128xf32>
    %3 = arith.fptosi %2 : vector<16x128xf32> to vector<16x128xi32>
    %4 = arith.sitofp %3 : vector<16x128xi32> to vector<16x128xf32>
    %5 = arith.subf %2, %4 : vector<16x128xf32>
    %c0_1 = arith.constant 0 : index
    %6 = memref.load %arg1[%c0_1] : memref<17xf32, #tpu.memory_space<smem>>
    %7 = vector.broadcast %6 : f32 to vector<16x128xf32>
    %c0_2 = arith.constant 0 : index
    %8 = memref.load %arg2[%c0_2] : memref<17xf32, #tpu.memory_space<smem>>
    %9 = vector.broadcast %8 : f32 to vector<16x128xf32>
    %c1_i32 = arith.constant 1 : i32
    %10 = vector.broadcast %c1_i32 : i32 to vector<16x128xi32>
    %11 = arith.cmpi eq, %3, %10 : vector<16x128xi32>
    %c1 = arith.constant 1 : index
    %12 = memref.load %arg1[%c1] : memref<17xf32, #tpu.memory_space<smem>>
    %13 = vector.broadcast %12 : f32 to vector<16x128xf32>
    %14 = arith.select %11, %13, %7 : vector<16x128xi1>, vector<16x128xf32>
    %c1_3 = arith.constant 1 : index
    %15 = memref.load %arg2[%c1_3] : memref<17xf32, #tpu.memory_space<smem>>
    %16 = vector.broadcast %15 : f32 to vector<16x128xf32>
    %17 = arith.select %11, %16, %9 : vector<16x128xi1>, vector<16x128xf32>
    %c2_i32 = arith.constant 2 : i32
    %18 = vector.broadcast %c2_i32 : i32 to vector<16x128xi32>
    %19 = arith.cmpi eq, %3, %18 : vector<16x128xi32>
    %c2 = arith.constant 2 : index
    %20 = memref.load %arg1[%c2] : memref<17xf32, #tpu.memory_space<smem>>
    %21 = vector.broadcast %20 : f32 to vector<16x128xf32>
    %22 = arith.select %19, %21, %14 : vector<16x128xi1>, vector<16x128xf32>
    %c2_4 = arith.constant 2 : index
    %23 = memref.load %arg2[%c2_4] : memref<17xf32, #tpu.memory_space<smem>>
    %24 = vector.broadcast %23 : f32 to vector<16x128xf32>
    %25 = arith.select %19, %24, %17 : vector<16x128xi1>, vector<16x128xf32>
    %c3_i32 = arith.constant 3 : i32
    %26 = vector.broadcast %c3_i32 : i32 to vector<16x128xi32>
    %27 = arith.cmpi eq, %3, %26 : vector<16x128xi32>
    %c3 = arith.constant 3 : index
    %28 = memref.load %arg1[%c3] : memref<17xf32, #tpu.memory_space<smem>>
    %29 = vector.broadcast %28 : f32 to vector<16x128xf32>
    %30 = arith.select %27, %29, %22 : vector<16x128xi1>, vector<16x128xf32>
    %c3_5 = arith.constant 3 : index
    %31 = memref.load %arg2[%c3_5] : memref<17xf32, #tpu.memory_space<smem>>
    %32 = vector.broadcast %31 : f32 to vector<16x128xf32>
    %33 = arith.select %27, %32, %25 : vector<16x128xi1>, vector<16x128xf32>
    %c4_i32 = arith.constant 4 : i32
    %34 = vector.broadcast %c4_i32 : i32 to vector<16x128xi32>
    %35 = arith.cmpi eq, %3, %34 : vector<16x128xi32>
    %c4 = arith.constant 4 : index
    %36 = memref.load %arg1[%c4] : memref<17xf32, #tpu.memory_space<smem>>
    %37 = vector.broadcast %36 : f32 to vector<16x128xf32>
    %38 = arith.select %35, %37, %30 : vector<16x128xi1>, vector<16x128xf32>
    %c4_6 = arith.constant 4 : index
    %39 = memref.load %arg2[%c4_6] : memref<17xf32, #tpu.memory_space<smem>>
    %40 = vector.broadcast %39 : f32 to vector<16x128xf32>
    %41 = arith.select %35, %40, %33 : vector<16x128xi1>, vector<16x128xf32>
    %c5_i32 = arith.constant 5 : i32
    %42 = vector.broadcast %c5_i32 : i32 to vector<16x128xi32>
    %43 = arith.cmpi eq, %3, %42 : vector<16x128xi32>
    %c5 = arith.constant 5 : index
    %44 = memref.load %arg1[%c5] : memref<17xf32, #tpu.memory_space<smem>>
    %45 = vector.broadcast %44 : f32 to vector<16x128xf32>
    %46 = arith.select %43, %45, %38 : vector<16x128xi1>, vector<16x128xf32>
    %c5_7 = arith.constant 5 : index
    %47 = memref.load %arg2[%c5_7] : memref<17xf32, #tpu.memory_space<smem>>
    %48 = vector.broadcast %47 : f32 to vector<16x128xf32>
    %49 = arith.select %43, %48, %41 : vector<16x128xi1>, vector<16x128xf32>
    %c6_i32 = arith.constant 6 : i32
    %50 = vector.broadcast %c6_i32 : i32 to vector<16x128xi32>
    %51 = arith.cmpi eq, %3, %50 : vector<16x128xi32>
    %c6 = arith.constant 6 : index
    %52 = memref.load %arg1[%c6] : memref<17xf32, #tpu.memory_space<smem>>
    %53 = vector.broadcast %52 : f32 to vector<16x128xf32>
    %54 = arith.select %51, %53, %46 : vector<16x128xi1>, vector<16x128xf32>
    %c6_8 = arith.constant 6 : index
    %55 = memref.load %arg2[%c6_8] : memref<17xf32, #tpu.memory_space<smem>>
    %56 = vector.broadcast %55 : f32 to vector<16x128xf32>
    %57 = arith.select %51, %56, %49 : vector<16x128xi1>, vector<16x128xf32>
    %c7_i32 = arith.constant 7 : i32
    %58 = vector.broadcast %c7_i32 : i32 to vector<16x128xi32>
    %59 = arith.cmpi eq, %3, %58 : vector<16x128xi32>
    %c7 = arith.constant 7 : index
    %60 = memref.load %arg1[%c7] : memref<17xf32, #tpu.memory_space<smem>>
    %61 = vector.broadcast %60 : f32 to vector<16x128xf32>
    %62 = arith.select %59, %61, %54 : vector<16x128xi1>, vector<16x128xf32>
    %c7_9 = arith.constant 7 : index
    %63 = memref.load %arg2[%c7_9] : memref<17xf32, #tpu.memory_space<smem>>
    %64 = vector.broadcast %63 : f32 to vector<16x128xf32>
    %65 = arith.select %59, %64, %57 : vector<16x128xi1>, vector<16x128xf32>
    %c8_i32 = arith.constant 8 : i32
    %66 = vector.broadcast %c8_i32 : i32 to vector<16x128xi32>
    %67 = arith.cmpi eq, %3, %66 : vector<16x128xi32>
    %c8 = arith.constant 8 : index
    %68 = memref.load %arg1[%c8] : memref<17xf32, #tpu.memory_space<smem>>
    %69 = vector.broadcast %68 : f32 to vector<16x128xf32>
    %70 = arith.select %67, %69, %62 : vector<16x128xi1>, vector<16x128xf32>
    %c8_10 = arith.constant 8 : index
    %71 = memref.load %arg2[%c8_10] : memref<17xf32, #tpu.memory_space<smem>>
    %72 = vector.broadcast %71 : f32 to vector<16x128xf32>
    %73 = arith.select %67, %72, %65 : vector<16x128xi1>, vector<16x128xf32>
    %c9_i32 = arith.constant 9 : i32
    %74 = vector.broadcast %c9_i32 : i32 to vector<16x128xi32>
    %75 = arith.cmpi eq, %3, %74 : vector<16x128xi32>
    %c9 = arith.constant 9 : index
    %76 = memref.load %arg1[%c9] : memref<17xf32, #tpu.memory_space<smem>>
    %77 = vector.broadcast %76 : f32 to vector<16x128xf32>
    %78 = arith.select %75, %77, %70 : vector<16x128xi1>, vector<16x128xf32>
    %c9_11 = arith.constant 9 : index
    %79 = memref.load %arg2[%c9_11] : memref<17xf32, #tpu.memory_space<smem>>
    %80 = vector.broadcast %79 : f32 to vector<16x128xf32>
    %81 = arith.select %75, %80, %73 : vector<16x128xi1>, vector<16x128xf32>
    %c10_i32 = arith.constant 10 : i32
    %82 = vector.broadcast %c10_i32 : i32 to vector<16x128xi32>
    %83 = arith.cmpi eq, %3, %82 : vector<16x128xi32>
    %c10 = arith.constant 10 : index
    %84 = memref.load %arg1[%c10] : memref<17xf32, #tpu.memory_space<smem>>
    %85 = vector.broadcast %84 : f32 to vector<16x128xf32>
    %86 = arith.select %83, %85, %78 : vector<16x128xi1>, vector<16x128xf32>
    %c10_12 = arith.constant 10 : index
    %87 = memref.load %arg2[%c10_12] : memref<17xf32, #tpu.memory_space<smem>>
    %88 = vector.broadcast %87 : f32 to vector<16x128xf32>
    %89 = arith.select %83, %88, %81 : vector<16x128xi1>, vector<16x128xf32>
    %c11_i32 = arith.constant 11 : i32
    %90 = vector.broadcast %c11_i32 : i32 to vector<16x128xi32>
    %91 = arith.cmpi eq, %3, %90 : vector<16x128xi32>
    %c11 = arith.constant 11 : index
    %92 = memref.load %arg1[%c11] : memref<17xf32, #tpu.memory_space<smem>>
    %93 = vector.broadcast %92 : f32 to vector<16x128xf32>
    %94 = arith.select %91, %93, %86 : vector<16x128xi1>, vector<16x128xf32>
    %c11_13 = arith.constant 11 : index
    %95 = memref.load %arg2[%c11_13] : memref<17xf32, #tpu.memory_space<smem>>
    %96 = vector.broadcast %95 : f32 to vector<16x128xf32>
    %97 = arith.select %91, %96, %89 : vector<16x128xi1>, vector<16x128xf32>
    %c12_i32 = arith.constant 12 : i32
    %98 = vector.broadcast %c12_i32 : i32 to vector<16x128xi32>
    %99 = arith.cmpi eq, %3, %98 : vector<16x128xi32>
    %c12 = arith.constant 12 : index
    %100 = memref.load %arg1[%c12] : memref<17xf32, #tpu.memory_space<smem>>
    %101 = vector.broadcast %100 : f32 to vector<16x128xf32>
    %102 = arith.select %99, %101, %94 : vector<16x128xi1>, vector<16x128xf32>
    %c12_14 = arith.constant 12 : index
    %103 = memref.load %arg2[%c12_14] : memref<17xf32, #tpu.memory_space<smem>>
    %104 = vector.broadcast %103 : f32 to vector<16x128xf32>
    %105 = arith.select %99, %104, %97 : vector<16x128xi1>, vector<16x128xf32>
    %c13_i32 = arith.constant 13 : i32
    %106 = vector.broadcast %c13_i32 : i32 to vector<16x128xi32>
    %107 = arith.cmpi eq, %3, %106 : vector<16x128xi32>
    %c13 = arith.constant 13 : index
    %108 = memref.load %arg1[%c13] : memref<17xf32, #tpu.memory_space<smem>>
    %109 = vector.broadcast %108 : f32 to vector<16x128xf32>
    %110 = arith.select %107, %109, %102 : vector<16x128xi1>, vector<16x128xf32>
    %c13_15 = arith.constant 13 : index
    %111 = memref.load %arg2[%c13_15] : memref<17xf32, #tpu.memory_space<smem>>
    %112 = vector.broadcast %111 : f32 to vector<16x128xf32>
    %113 = arith.select %107, %112, %105 : vector<16x128xi1>, vector<16x128xf32>
    %c14_i32 = arith.constant 14 : i32
    %114 = vector.broadcast %c14_i32 : i32 to vector<16x128xi32>
    %115 = arith.cmpi eq, %3, %114 : vector<16x128xi32>
    %c14 = arith.constant 14 : index
    %116 = memref.load %arg1[%c14] : memref<17xf32, #tpu.memory_space<smem>>
    %117 = vector.broadcast %116 : f32 to vector<16x128xf32>
    %118 = arith.select %115, %117, %110 : vector<16x128xi1>, vector<16x128xf32>
    %c14_16 = arith.constant 14 : index
    %119 = memref.load %arg2[%c14_16] : memref<17xf32, #tpu.memory_space<smem>>
    %120 = vector.broadcast %119 : f32 to vector<16x128xf32>
    %121 = arith.select %115, %120, %113 : vector<16x128xi1>, vector<16x128xf32>
    %c15_i32 = arith.constant 15 : i32
    %122 = vector.broadcast %c15_i32 : i32 to vector<16x128xi32>
    %123 = arith.cmpi eq, %3, %122 : vector<16x128xi32>
    %c15 = arith.constant 15 : index
    %124 = memref.load %arg1[%c15] : memref<17xf32, #tpu.memory_space<smem>>
    %125 = vector.broadcast %124 : f32 to vector<16x128xf32>
    %126 = arith.select %123, %125, %118 : vector<16x128xi1>, vector<16x128xf32>
    %c15_17 = arith.constant 15 : index
    %127 = memref.load %arg2[%c15_17] : memref<17xf32, #tpu.memory_space<smem>>
    %128 = vector.broadcast %127 : f32 to vector<16x128xf32>
    %129 = arith.select %123, %128, %121 : vector<16x128xi1>, vector<16x128xf32>
    %c16_i32 = arith.constant 16 : i32
    %130 = vector.broadcast %c16_i32 : i32 to vector<16x128xi32>
    %131 = arith.cmpi sge, %3, %130 : vector<16x128xi32>
    %c16 = arith.constant 16 : index
    %132 = memref.load %arg1[%c16] : memref<17xf32, #tpu.memory_space<smem>>
    %133 = vector.broadcast %132 : f32 to vector<16x128xf32>
    %134 = arith.select %131, %133, %126 : vector<16x128xi1>, vector<16x128xf32>
    %c16_18 = arith.constant 16 : index
    %135 = memref.load %arg2[%c16_18] : memref<17xf32, #tpu.memory_space<smem>>
    %136 = vector.broadcast %135 : f32 to vector<16x128xf32>
    %137 = arith.select %131, %136, %129 : vector<16x128xi1>, vector<16x128xf32>
    %138 = arith.mulf %5, %137 : vector<16x128xf32>
    %139 = arith.addf %134, %138 : vector<16x128xf32>
    %c0_19 = arith.constant 0 : index
    %c0_20 = arith.constant 0 : index
    %140 = vector.load %arg4[%c0_19, %c0_20] : memref<16x128xf32, #tpu.memory_space<vmem>>, vector<16x128xf32>
    tpu.vector_store %arg4[%c0_19, %c0_20], %139 {strides = array<i32>} : memref<16x128xf32, #tpu.memory_space<vmem>>, vector<16x128xf32>,
    return
  }
  func.func @transform_0(%arg0: i32) -> i32 {
    %c0_i32 = arith.constant 0 : i32
    %c0_i32_0 = arith.constant 0 : i32
    return %c0_i32 : i32
  }
  func.func @transform_1(%arg0: i32) -> i32 {
    %c0_i32 = arith.constant 0 : i32
    %c0_i32_0 = arith.constant 0 : i32
    return %c0_i32 : i32
  }
  func.func @transform_2(%arg0: i32) -> (i32, i32) {
    %c0_i32 = arith.constant 0 : i32
    %c0_i32_0 = arith.constant 0 : i32
    return %arg0, %c0_i32 : i32, i32
  }
  func.func @transform_3(%arg0: i32) -> (i32, i32) {
    %c0_i32 = arith.constant 0 : i32
    %c0_i32_0 = arith.constant 0 : i32
    return %arg0, %c0_i32 : i32, i32
  }
}

</mosaic_0001>

<bundles_post_ra>
// kernel: tpu_custom_call.1
= control target key start
LH: loop header
LB: loop body
LE: loop exit
PB: predicated region body
PF: predicated region fallthrough
CT: control target
= control target key end

     0   :  { %8 = vsyncpa [#allocation5], 0  ;;  %s567_s0 = inlined_call_operand.hbm [shape: f32[17], index: 0, kind: input, shape index: {}]   ;;  %s568_s1 = inlined_call_operand.hbm [shape: f32[17], index: 1, kind: input, shape index: {}]   ;;  %s569_s2 = inlined_call_operand.hbm [shape: f32[16,128], index: 2, kind: input, shape index: {}]   ;;  %s570_s3 = inlined_call_operand.hbm [shape: f32[16,128], index: 3, kind: output, shape index: {}]  }
   0x1   :  { %9 = vsyncpa [#allocation7], 0 }
   0x2   :  { %10 = vsyncpa [#allocation3], 0 }
   0x3   :  { %11 = vsyncpa [#allocation4], 0  ;;  %s17_s14 = sshll.u32 %s567_s0, 4  ;;  %s26_s17 = sshll.u32 %s568_s1, 4  ;;  %s18_s14 = int_to_ptr.hbm [resolvable:$true] %s17_s14  ;;  %s27_s17 = int_to_ptr.hbm [resolvable:$true] %s26_s17 }
   0x4   :  { %s385_s18 = smov [#allocation2]   ;;  %s386_s19 = smov [#allocation6]  }
   0x5   :  { %20 = dma.hbm_to_smem %s18_s14, 16, %s385_s18, [#allocation5]  }
   0x6   :  { %29 = dma.hbm_to_smem %s27_s17, 16, %s386_s19, [#allocation7]  }
   0x7   :  { %s34_s22 = sshll.u32 %s569_s2, 4  ;;  %s387_s23 = smov [#allocation8]   ;;  %s35_s22 = int_to_ptr.hbm [resolvable:$true] %s34_s22 }
   0x8   :  { %s36_s24 = sshll.u32 %s387_s23, 4  ;;  %s388_s25 = smov 128   ;;  %s37_s24 = int_to_ptr.vmem [resolvable:$true] %s36_s24 }
   0x9   :  { %s389_s0 = smov 8  }
   0xa   :  { %42 = dma.hbm_to_vmem [thread:$0]  %s35_s22, 256, %s37_s24, [#allocation3], %s388_s25, %s388_s25, %s389_s0  }
   0xb   :  { %377 = dma.done.wait [#allocation5], 16  }
   0xc   :  { %378 = vsyncadd [#allocation5], 4294967280 }
   0xd   :  { %379 = dma.done.wait [#allocation7], 16  }
   0xe   :  { %380 = vsyncadd [#allocation7], 4294967280 }
   0xf   :  { %381 = dma.done.wait [#allocation3], 256  }
  0x10   :  { %382 = vsyncadd [#allocation3], 4294967040 }
  0x11   :  { %55 = sfence }
  0x12   :  { %v56_v0 = vld [vmem:[#allocation8] sm:$0xff]  ;;  %v57_v1 = vld [vmem:[#allocation8 + $0x8] sm:$0xff]  ;;  %s423_s1 = sld [smem:[#allocation2]] }
  0x13   :  { %v58_v2 = vmul.f32 16.0, %v56_v0  ;;  %v59_v3 = vmul.f32 16.0, %v57_v1  ;;  %s425_s2 = sld [smem:[#allocation6]] }
  0x14   :  { %s257_s26 = sld [smem:[#allocation2 + $0x1]] }
  0x15   :  { %vm289_vm0 = vcmp.lt.s32.totalorder %v58_v2, 0  ;;  %v290_v4 = vceil.f32 %v58_v2  ;;  %v291_v5 = vfloor.f32 %v58_v2  ;;  %vm294_vm1 = vcmp.lt.s32.totalorder %v59_v3, 0  ;;  %s258_s27 = sld [smem:[#allocation6 + $0x1]] }
  0x16   :  { %v295_v6 = vceil.f32 %v59_v3  ;;  %v296_v7 = vfloor.f32 %v59_v3  ;;  %s427_s28 = sld [smem:[#allocation2 + $0x2]] }
  0x17   :  { %v292_v8 = vsel %vm289_vm0, %v290_v4, %v291_v5  ;;  %s429_s29 = sld [smem:[#allocation6 + $0x2]] }
  0x18   :  { %v431_v9 = vcvt.f32.s32 %v292_v8  ;;  %v297_v10 = vsel %vm294_vm1, %v295_v6, %v296_v7  ;;  %v67_v11 = vstv %s423_s1  ;;  %s434_s30 = sld [smem:[#allocation2 + $0x3]] }
  0x19   :  { %v436_v12 = vcvt.f32.s32 %v297_v10  ;;  %v69_v13 = vstv %s425_s2  ;;  %s439_s4 = sld [smem:[#allocation6 + $0x3]] }
  0x1a   :  { %v62_v14 = vcvt.s32.f32 %v431_v9  ;;  %vm70_vm2 = vcmp.eq.s32.totalorder %v431_v9, 1  ;;  %v73_v15 = vstv %s257_s26  ;;  %vm80_vm3 = vcmp.eq.s32.totalorder %v431_v9, 2  ;;  %s444_s5 = sld [smem:[#allocation2 + $0x4]] }
  0x1b   :  { %v63_v16 = vcvt.s32.f32 %v436_v12  ;;  %vm71_vm4 = vcmp.eq.s32.totalorder %v436_v12, 1  ;;  %v74_v17 = vsel %vm70_vm2, %v73_v15, %v67_v11  ;;  %v77_v18 = vstv %s258_s27  ;;  %s448_s6 = sld [smem:[#allocation6 + $0x4]] }
  0x1c   :  { %v450_v19 = vsub.f32 %v58_v2, %v62_v14  ;;  %v75_v20 = vsel %vm71_vm4, %v73_v15, %v67_v11  ;;  %v78_v21 = vsel %vm70_vm2, %v77_v18, %v69_v13  ;;  %v79_v22 = vsel %vm71_vm4, %v77_v18, %v69_v13  ;;  %s452_s7 = sld [smem:[#allocation2 + $0x5]] }
  0x1d   :  { %v454_v23 = vsub.f32 %v59_v3, %v63_v16  ;;  %vm81_vm5 = vcmp.eq.s32.totalorder %v436_v12, 2  ;;  %v83_v24 = vstv %s427_s28  ;;  %v87_v25 = vstv %s429_s29  ;;  %s459_s8 = sld [smem:[#allocation6 + $0x5]] }
  0x1e   :  { %v84_v26 = vsel %vm80_vm3, %v83_v24, %v74_v17  ;;  %v85_v27 = vsel %vm81_vm5, %v83_v24, %v75_v20  ;;  %v88_v28 = vsel %vm80_vm3, %v87_v25, %v78_v21  ;;  %v89_v29 = vsel %vm81_vm5, %v87_v25, %v79_v22  ;;  %s465_s9 = sld [smem:[#allocation2 + $0x6]] }
  0x1f   :  { %vm90_vm6 = vcmp.eq.s32.totalorder %v431_v9, 3  ;;  %vm91_vm7 = vcmp.eq.s32.totalorder %v436_v12, 3  ;;  %v93_v30 = vstv %s434_s30  ;;  %v97_v31 = vstv %s439_s4  ;;  %s471_s10 = sld [smem:[#allocation6 + $0x6]]  ;;  %s390_s30 = smov [#allocation9]  }
  0x20   :  { %v94_v32 = vsel %vm90_vm6, %v93_v30, %v84_v26  ;;  %v95_v33 = vsel %vm91_vm7, %v93_v30, %v85_v27  ;;  %v98_v34 = vsel %vm90_vm6, %v97_v31, %v88_v28  ;;  %v99_v35 = vsel %vm91_vm7, %v97_v31, %v89_v29  ;;  %s473_s11 = sld [smem:[#allocation2 + $0x7]]  ;;  %s240_s4 = sshll.u32 %s390_s30, 4  ;;  %s241_s4 = int_to_ptr.vmem [resolvable:$true] %s240_s4 }
  0x21   :  { %vm100_vm8 = vcmp.eq.s32.totalorder %v431_v9, 4  ;;  %vm101_vm9 = vcmp.eq.s32.totalorder %v436_v12, 4  ;;  %v103_v36 = vstv %s444_s5  ;;  %v107_v37 = vstv %s448_s6  ;;  %s479_s12 = sld [smem:[#allocation6 + $0x7]] }
  0x22   :  { %v104_v38 = vsel %vm100_vm8, %v103_v36, %v94_v32  ;;  %v105_v39 = vsel %vm101_vm9, %v103_v36, %v95_v33  ;;  %v108_v40 = vsel %vm100_vm8, %v107_v37, %v98_v34  ;;  %v109_v41 = vsel %vm101_vm9, %v107_v37, %v99_v35  ;;  %s481_s13 = sld [smem:[#allocation2 + $0x8]] }
  0x23   :  { %vm110_vm10 = vcmp.eq.s32.totalorder %v431_v9, 5  ;;  %vm111_vm11 = vcmp.eq.s32.totalorder %v436_v12, 5  ;;  %v113_v42 = vstv %s452_s7  ;;  %v117_v43 = vstv %s459_s8  ;;  %s487_s14 = sld [smem:[#allocation6 + $0x8]]  ;;  %s242_s7 = sshll.u32 %s570_s3, 4  ;;  %s243_s7 = int_to_ptr.hbm [resolvable:$true] %s242_s7 }
  0x24   :  { %v114_v44 = vsel %vm110_vm10, %v113_v42, %v104_v38  ;;  %v115_v45 = vsel %vm111_vm11, %v113_v42, %v105_v39  ;;  %v118_v46 = vsel %vm110_vm10, %v117_v43, %v108_v40  ;;  %v119_v47 = vsel %vm111_vm11, %v117_v43, %v109_v41  ;;  %s489_s15 = sld [smem:[#allocation2 + $0x9]] }
  0x25   :  { %vm120_vm12 = vcmp.eq.s32.totalorder %v431_v9, 6  ;;  %vm121_vm13 = vcmp.eq.s32.totalorder %v436_v12, 6  ;;  %v123_v48 = vstv %s465_s9  ;;  %v127_v49 = vstv %s471_s10  ;;  %s495_s16 = sld [smem:[#allocation6 + $0x9]] }
  0x26   :  { %v124_v50 = vsel %vm120_vm12, %v123_v48, %v114_v44  ;;  %v125_v51 = vsel %vm121_vm13, %v123_v48, %v115_v45  ;;  %v128_v52 = vsel %vm120_vm12, %v127_v49, %v118_v46  ;;  %v129_v53 = vsel %vm121_vm13, %v127_v49, %v119_v47  ;;  %s497_s17 = sld [smem:[#allocation2 + $0xa]] }
  0x27   :  { %vm130_vm14 = vcmp.eq.s32.totalorder %v431_v9, 7  ;;  %vm131_vm15 = vcmp.eq.s32.totalorder %v436_v12, 7  ;;  %v133_v54 = vstv %s473_s11  ;;  %v137_v55 = vstv %s479_s12  ;;  %s503_s18 = sld [smem:[#allocation6 + $0xa]] }
  0x28   :  { %v134_v56 = vsel %vm130_vm14, %v133_v54, %v124_v50  ;;  %v135_v57 = vsel %vm131_vm15, %v133_v54, %v125_v51  ;;  %v138_v58 = vsel %vm130_vm14, %v137_v55, %v128_v52  ;;  %v139_v59 = vsel %vm131_vm15, %v137_v55, %v129_v53  ;;  %s505_s19 = sld [smem:[#allocation2 + $0xb]] }
  0x29   :  { %vm140_vm0 = vcmp.eq.s32.totalorder %v431_v9, 8  ;;  %vm141_vm1 = vcmp.eq.s32.totalorder %v436_v12, 8  ;;  %v143_v60 = vstv %s481_s13  ;;  %v147_v61 = vstv %s487_s14  ;;  %s511_s20 = sld [smem:[#allocation6 + $0xb]] }
  0x2a   :  { %v144_v62 = vsel %vm140_vm0, %v143_v60, %v134_v56  ;;  %v145_v63 = vsel %vm141_vm1, %v143_v60, %v135_v57  ;;  %v148_v0 = vsel %vm140_vm0, %v147_v61, %v138_v58  ;;  %v149_v1 = vsel %vm141_vm1, %v147_v61, %v139_v59  ;;  %s513_s21 = sld [smem:[#allocation2 + $0xc]] }
  0x2b   :  { %vm150_vm2 = vcmp.eq.s32.totalorder %v431_v9, 9  ;;  %vm151_vm3 = vcmp.eq.s32.totalorder %v436_v12, 9  ;;  %v153_v2 = vstv %s489_s15  ;;  %v157_v3 = vstv %s495_s16  ;;  %s519_s22 = sld [smem:[#allocation6 + $0xc]] }
  0x2c   :  { %v154_v4 = vsel %vm150_vm2, %v153_v2, %v144_v62  ;;  %v155_v5 = vsel %vm151_vm3, %v153_v2, %v145_v63  ;;  %v158_v6 = vsel %vm150_vm2, %v157_v3, %v148_v0  ;;  %v159_v7 = vsel %vm151_vm3, %v157_v3, %v149_v1  ;;  %s521_s23 = sld [smem:[#allocation2 + $0xd]] }
  0x2d   :  { %vm160_vm4 = vcmp.eq.s32.totalorder %v431_v9, 10  ;;  %vm161_vm5 = vcmp.eq.s32.totalorder %v436_v12, 10  ;;  %v163_v8 = vstv %s497_s17  ;;  %v167_v10 = vstv %s503_s18  ;;  %s527_s24 = sld [smem:[#allocation6 + $0xd]] }
  0x2e   :  { %v164_v11 = vsel %vm160_vm4, %v163_v8, %v154_v4  ;;  %v165_v13 = vsel %vm161_vm5, %v163_v8, %v155_v5  ;;  %v168_v14 = vsel %vm160_vm4, %v167_v10, %v158_v6  ;;  %v169_v15 = vsel %vm161_vm5, %v167_v10, %v159_v7  ;;  %s529_s1 = sld [smem:[#allocation2 + $0xe]] }
  0x2f   :  { %vm170_vm6 = vcmp.eq.s32.totalorder %v431_v9, 11  ;;  %vm171_vm7 = vcmp.eq.s32.totalorder %v436_v12, 11  ;;  %v173_v16 = vstv %s505_s19  ;;  %v177_v17 = vstv %s511_s20  ;;  %s535_s2 = sld [smem:[#allocation6 + $0xe]] }
  0x30   :  { %v174_v18 = vsel %vm170_vm6, %v173_v16, %v164_v11  ;;  %v175_v20 = vsel %vm171_vm7, %v173_v16, %v165_v13  ;;  %v178_v21 = vsel %vm170_vm6, %v177_v17, %v168_v14  ;;  %v179_v22 = vsel %vm171_vm7, %v177_v17, %v169_v15  ;;  %s537_s26 = sld [smem:[#allocation2 + $0xf]] }
  0x31   :  { %vm180_vm8 = vcmp.eq.s32.totalorder %v431_v9, 12  ;;  %vm181_vm9 = vcmp.eq.s32.totalorder %v436_v12, 12  ;;  %v183_v24 = vstv %s513_s21  ;;  %v187_v25 = vstv %s519_s22  ;;  %s286_s27 = sld [smem:[#allocation6 + $0xf]] }
  0x32   :  { %v184_v26 = vsel %vm180_vm8, %v183_v24, %v174_v18  ;;  %v185_v27 = vsel %vm181_vm9, %v183_v24, %v175_v20  ;;  %v188_v28 = vsel %vm180_vm8, %v187_v25, %v178_v21  ;;  %v189_v29 = vsel %vm181_vm9, %v187_v25, %v179_v22  ;;  %s543_s28 = sld [smem:[#allocation2 + $0x10]] }
  0x33   :  { %vm190_vm10 = vcmp.eq.s32.totalorder %v431_v9, 13  ;;  %vm191_vm11 = vcmp.eq.s32.totalorder %v436_v12, 13  ;;  %v193_v30 = vstv %s521_s23  ;;  %v197_v31 = vstv %s527_s24  ;;  %s288_s29 = sld [smem:[#allocation6 + $0x10]] }
  0x34   :  { %v194_v32 = vsel %vm190_vm10, %v193_v30, %v184_v26  ;;  %v195_v33 = vsel %vm191_vm11, %v193_v30, %v185_v27  ;;  %v198_v34 = vsel %vm190_vm10, %v197_v31, %v188_v28  ;;  %v199_v35 = vsel %vm191_vm11, %v197_v31, %v189_v29 }
  0x35   :  { %vm200_vm12 = vcmp.eq.s32.totalorder %v431_v9, 14  ;;  %vm201_vm13 = vcmp.eq.s32.totalorder %v436_v12, 14  ;;  %v203_v36 = vstv %s529_s1  ;;  %v207_v37 = vstv %s535_s2 }
  0x36   :  { %v204_v38 = vsel %vm200_vm12, %v203_v36, %v194_v32  ;;  %v205_v39 = vsel %vm201_vm13, %v203_v36, %v195_v33  ;;  %v208_v40 = vsel %vm200_vm12, %v207_v37, %v198_v34  ;;  %v209_v41 = vsel %vm201_vm13, %v207_v37, %v199_v35 }
  0x37   :  { %vm210_vm14 = vcmp.eq.s32.totalorder %v431_v9, 15  ;;  %vm211_vm15 = vcmp.eq.s32.totalorder %v436_v12, 15  ;;  %v213_v42 = vstv %s537_s26  ;;  %v217_v43 = vstv %s286_s27 }
  0x38   :  { %v214_v44 = vsel %vm210_vm14, %v213_v42, %v204_v38  ;;  %v215_v45 = vsel %vm211_vm15, %v213_v42, %v205_v39  ;;  %v218_v46 = vsel %vm210_vm14, %v217_v43, %v208_v40  ;;  %v219_v47 = vsel %vm211_vm15, %v217_v43, %v209_v41 }
  0x39   :  { %vm220_vm0 = vcmp.ge.s32.totalorder %v431_v9, 16  ;;  %vm221_vm1 = vcmp.ge.s32.totalorder %v436_v12, 16  ;;  %v223_v48 = vstv %s543_s28  ;;  %v227_v49 = vstv %s288_s29 }
  0x3a   :  { %v224_v50 = vsel %vm220_vm0, %v223_v48, %v214_v44  ;;  %v225_v51 = vsel %vm221_vm1, %v223_v48, %v215_v45  ;;  %v228_v52 = vsel %vm220_vm0, %v227_v49, %v218_v46  ;;  %v229_v53 = vsel %vm221_vm1, %v227_v49, %v219_v47 }
  0x3b   :  { %v230_v54 = vmul.f32 %v228_v52, %v450_v19  ;;  %v231_v55 = vmul.f32 %v229_v53, %v454_v23 }
  0x3d   :  { %v232_v56 = vadd.f32 %v230_v54, %v224_v50  ;;  %v233_v9 = vadd.f32 %v231_v55, %v225_v51 }
  0x3f   :  { %234 = vst [vmem:[#allocation9] sm:$0xff] %v232_v56 }
  0x40   :  { %235 = vst [vmem:[#allocation9 + $0x8] sm:$0xff] %v233_v9 }
  0x41   :  { %248 = dma.vmem_to_hbm [thread:$0]  %s241_s4, 256, %s243_s7, [#allocation4], %s388_s25, %s388_s25, %s389_s0  }
  0x42   :  { %383 = dma.done.wait [#allocation4], 256  }
  0x43   :  { %384 = vsyncadd [#allocation4], 4294967040 }
  0x44   :  { %253 = vsyncpa [#allocation3], 1 }
  0x45   :  { %254 = vsyncpa [#allocation4], 1 }
  0x46   :  { %255 = vsyncpa [#allocation5], 1 }
  0x47   :  { %256 = vsyncpa [#allocation7], 1 }

</bundles_post_ra>
